<compile_context>
chip_gen: v7x
topology: tpu7x:2x2x1
jax: 0.10.0
libtpu: 0.0.40
codegen_flags: <defaults>
</compile_context>

<pallas_src>
import functools

import jax
import jax.numpy as jnp
from jax.experimental import pallas as pl
from jax.experimental.pallas import tpu as pltpu


def _round_up(x, m):
    return (x + m - 1) // m * m


def _pick_tiling(n):
    """Node-dim padding + square tile size.

    Large graphs pad straight to 512-multiples (512-tiles stream at ~85% of
    the HBM roofline vs ~63% at 256); small graphs keep 128-granularity
    padding so the N^2 adjacency padding waste stays bounded.
    """
    if n >= 4096:
        n_pad = _round_up(n, 512)
        tile = 512
    else:
        n_pad = _round_up(n, 128)
        if n_pad % 512 == 0:
            tile = 512
        elif n_pad % 256 == 0:
            tile = 256
        else:
            tile = 128
    return n_pad, tile


# ---------------------------------------------------------------------------
# Fused GCNConv aggregation kernel.
#   i == 0 sweep:  H[k-tile] = (D^{-1/2} X)[k-tile] @ W  -> VMEM cache (bf16)
#   every step:    out[i-tile] += A_hat_int8[i, k].bf16 @ H[k-tile]
#   k == last:     out[i-tile] *= D^{-1/2}[i-tile]
# ---------------------------------------------------------------------------
def _gcn_conv_kernel(x_ref, w_ref, adj_ref, dinv_ref, out_ref, h_cache_ref, *,
                     tk):
    i = pl.program_id(0)
    k = pl.program_id(1)
    kk = pl.multiple_of(k * tk, tk)

    @pl.when(k == 0)
    def _():
        out_ref[...] = jnp.zeros_like(out_ref)

    @pl.when(i == 0)
    def _():
        # First row-tile sweep: compute the hidden tile once and cache it so
        # later row tiles neither re-DMA x nor redo the X @ W matmul.
        h = jnp.dot(x_ref[...], w_ref[...],
                    preferred_element_type=jnp.float32)       # (tk, Hp) f32
        h_cache_ref[pl.ds(kk, tk), :] = h.astype(jnp.bfloat16)

    h_k = h_cache_ref[pl.ds(kk, tk), :]                       # (tk, Hp) bf16
    # adj travels over HBM as int8; cast after the DMA (via f32 for a safe
    # lowering) so no integer MXU is needed; bf16 x bf16 -> f32 accumulation.
    adj_bf16 = adj_ref[...].astype(jnp.float32).astype(jnp.bfloat16)
    out_ref[...] += jnp.dot(adj_bf16, h_k,
                            preferred_element_type=jnp.float32)

    @pl.when(k == pl.num_programs(1) - 1)
    def _():
        out_ref[...] = out_ref[...] * dinv_ref[...]           # D^{-1/2}[dst]


def _gcn_aggregate(x_pad, w_pad, adj_pad, dinv_pad, *, tm, tk):
    n_pad, fin_pad = x_pad.shape
    h_pad = w_pad.shape[1]
    grid = (n_pad // tm, n_pad // tk)

    flops = 2 * n_pad * n_pad * h_pad + 2 * n_pad * fin_pad * h_pad
    bytes_accessed = (adj_pad.size * 1              # int8 adjacency, read once
                      + x_pad.size * 2 + w_pad.size * 2
                      + n_pad * h_pad * 4 + n_pad * 4)

    # VMEM budget: H cache + double-buffered tiles (+ headroom); raised above
    # the 16/32 MiB scoped defaults so 512-tiles fit, capped well below any
    # generation's physical VMEM.
    vmem_est = (n_pad * h_pad * 2            # H cache scratch (bf16)
                + 2 * tm * tk                # adj tile (int8), 2 buffers
                + 2 * tk * fin_pad * 2       # x tile (bf16)
                + 2 * fin_pad * h_pad * 2    # W (bf16)
                + 2 * tm * h_pad * 4         # out tile (f32)
                + 2 * tm * 4)                # dinv tile (f32)
    vmem_limit = int(min(max(2 * vmem_est + (8 << 20), 32 << 20), 100 << 20))

    kernel = functools.partial(_gcn_conv_kernel, tk=tk)
    return pl.pallas_call(
        kernel,
        out_shape=jax.ShapeDtypeStruct((n_pad, h_pad), jnp.float32),
        grid_spec=pltpu.PrefetchScalarGridSpec(
            num_scalar_prefetch=0,
            grid=grid,
            in_specs=[
                # x is only consumed on the i == 0 sweep; pin its block index
                # to 0 afterwards so the pipeline stops re-fetching it.
                pl.BlockSpec((tk, fin_pad),
                             lambda i, k: (jnp.where(i == 0, k, 0), 0)),
                pl.BlockSpec((fin_pad, h_pad), lambda i, k: (0, 0)),   # W
                pl.BlockSpec((tm, tk), lambda i, k: (i, k)),           # adj
                pl.BlockSpec((tm, 1), lambda i, k: (i, 0)),            # dinv
            ],
            out_specs=pl.BlockSpec((tm, h_pad), lambda i, k: (i, 0)),
            scratch_shapes=[pltpu.VMEM((n_pad, h_pad), jnp.bfloat16)],
        ),
        compiler_params=pltpu.CompilerParams(
            # Row axis must run sequentially (the H cache is filled at i == 0
            # and reused for i > 0), so both axes are "arbitrary".
            dimension_semantics=("arbitrary", "arbitrary"),
            vmem_limit_bytes=vmem_limit,
        ),
        cost_estimate=pl.CostEstimate(flops=int(flops), transcendentals=0,
                                      bytes_accessed=int(bytes_accessed)),
    )(x_pad, w_pad, adj_pad, dinv_pad)


# ---------------------------------------------------------------------------
# Wrapper: GCN.forward(x, edge_index)
# ---------------------------------------------------------------------------
def gcn_forward(x, edge_index, w):
    """out = D^{-1/2} (A + I) D^{-1/2} (x @ w), PyG GCNConv(bias=False).

    x: (N, F_in) float, edge_index: (2, E) int (row 0 = src, row 1 = dst),
    w: (F_in, H) float.  Self-loops are added here (add_self_loops=True).
    """
    n, f_in = x.shape
    h = w.shape[1]

    # --- O(E) graph preprocessing in plain JAX (no N^2 degree pass). --------
    loop = jnp.arange(n, dtype=edge_index.dtype)
    src = jnp.concatenate([edge_index[0], loop])
    dst = jnp.concatenate([edge_index[1], loop])
    deg = jax.ops.segment_sum(jnp.ones_like(dst, dtype=jnp.float32), dst,
                              num_segments=n)
    dinv = jnp.where(deg > 0.0, jax.lax.rsqrt(deg), 0.0)       # (N,) f32

    # --- padding / dtypes. ---------------------------------------------------
    n_pad, tile = _pick_tiling(n)
    tm = tk = tile
    fin_pad = _round_up(f_in, 128)
    h_pad = _round_up(h, 128)

    # Pre-scale x by D^{-1/2}[src]:  (D X) W == D (X W).
    x_scaled = (x.astype(jnp.float32) * dinv[:, None]).astype(jnp.bfloat16)
    x_pad = jnp.zeros((n_pad, fin_pad), jnp.bfloat16
                      ).at[:n, :f_in].set(x_scaled)
    w_pad = jnp.zeros((fin_pad, h_pad), jnp.bfloat16
                      ).at[:f_in, :h].set(w.astype(jnp.bfloat16))
    # Dense A_hat[dst, src] as int8 (duplicate edges accumulate, as in PyG).
    adj_pad = jnp.zeros((n_pad, n_pad), jnp.int8).at[dst, src].add(1)
    dinv_pad = jnp.zeros((n_pad, 1), jnp.float32).at[:n, 0].set(dinv)

    out_pad = _gcn_aggregate(x_pad, w_pad, adj_pad, dinv_pad, tm=tm, tk=tk)
    return out_pad[:n, :h]


if __name__ == "__main__":
    N = 300       # number of nodes -> n_pad = 384, 3x3 tile grid (multi-tile)
    E = 1500      # number of directed edges
    IN_C = 4      # in_channels
    HID_C = 32    # hidden_channels (conv1 output; out_channels unused here)

    key = jax.random.PRNGKey(0)
    k_x, k_s, k_d, k_w = jax.random.split(key, 4)

    # Node features.
    x = jax.random.normal(k_x, (N, IN_C), jnp.float32)

    # Synthetic edge_index [2, E] (src row, dst row).
    src = jax.random.randint(k_s, (E,), 0, N, dtype=jnp.int32)
    dst = jax.random.randint(k_d, (E,), 0, N, dtype=jnp.int32)
    edge_index = jnp.stack([src, dst], axis=0)

    # GCNConv lin weight (glorot init, bias=False).
    scale = jnp.sqrt(6.0 / (IN_C + HID_C))
    w = jax.random.uniform(k_w, (IN_C, HID_C), jnp.float32, -scale, scale)

    y = gcn_forward(x, edge_index, w)
    jax.block_until_ready(y)
    assert y.shape == (N, HID_C)

    # Plain-JAX f32 reference (same PyG GCNConv semantics).
    loop = jnp.arange(N, dtype=jnp.int32)
    src_f = jnp.concatenate([src, loop])
    dst_f = jnp.concatenate([dst, loop])
    adj_ref = jnp.zeros((N, N), jnp.float32).at[dst_f, src_f].add(1.0)
    deg_ref = adj_ref.sum(axis=1, keepdims=True)
    dinv_ref = jnp.where(deg_ref > 0, 1.0 / jnp.sqrt(deg_ref), 0.0)
    ref = dinv_ref * (adj_ref @ (dinv_ref * (x @ w)))
    err = float(jnp.max(jnp.abs(y - ref)))
    assert err < 0.1, f"max abs err {err}"   # bf16 feature path -> ~1e-2 err

    print("KERNEL_OK")
</pallas_src>

<mosaic_0001>
module attributes {stable_mosaic.version = 11 : i64} {
  func.func @_gcn_conv_kernel(%arg0: i32, %arg1: i32, %arg2: memref<128x128xbf16, #tpu.memory_space<vmem>>, %arg3: memref<128x128xbf16, #tpu.memory_space<vmem>>, %arg4: memref<128x128xi8, #tpu.memory_space<vmem>>, %arg5: memref<128x1xf32, #tpu.memory_space<vmem>>, %arg6: memref<128x128xf32, #tpu.memory_space<vmem>>, %arg7: memref<384x128xbf16, #tpu.memory_space<vmem>>) attributes {dimension_semantics = [#tpu.dimension_semantics<arbitrary>, #tpu.dimension_semantics<arbitrary>], iteration_bounds = array<i64: 3, 3>, scalar_prefetch = 0 : i64, scratch_operands = 1 : i64, tpu.core_type = #tpu.core_type<tc>, window_params = [{transform_indices = @transform_0, window_bounds = array<i64: 128, 128>}, {pipeline_mode = #tpu.pipeline_mode<synchronous>, transform_indices = @transform_1, window_bounds = array<i64: 128, 128>}, {transform_indices = @transform_2, window_bounds = array<i64: 128, 128>}, {transform_indices = @transform_3, window_bounds = array<i64: 128, 1>}, {transform_indices = @transform_4, window_bounds = array<i64: 128, 128>}]} {
    %c128_i32 = arith.constant 128 : i32
    %0 = arith.muli %arg1, %c128_i32 : i32
    %1 = tpu.assume_multiple %0, 128 : i32
    %c0_i32 = arith.constant 0 : i32
    %2 = arith.cmpi eq, %arg1, %c0_i32 : i32
    %3 = arith.extui %2 : i1 to i32
    %c0_i32_0 = arith.constant 0 : i32
    %4 = arith.cmpi ne, %3, %c0_i32_0 : i32
    scf.if %4 {
      %cst_10 = arith.constant 0.000000e+00 : f32
      %20 = vector.broadcast %cst_10 : f32 to vector<128x128xf32>
      %c0_11 = arith.constant 0 : index
      %c0_12 = arith.constant 0 : index
      %21 = vector.load %arg6[%c0_11, %c0_12] : memref<128x128xf32, #tpu.memory_space<vmem>>, vector<128x128xf32>
      tpu.vector_store %arg6[%c0_11, %c0_12], %20 {strides = array<i32>} : memref<128x128xf32, #tpu.memory_space<vmem>>, vector<128x128xf32>,
    } else {
    }
    %c0_i32_1 = arith.constant 0 : i32
    %5 = arith.cmpi eq, %arg0, %c0_i32_1 : i32
    %6 = arith.extui %5 : i1 to i32
    %c0_i32_2 = arith.constant 0 : i32
    %7 = arith.cmpi ne, %6, %c0_i32_2 : i32
    scf.if %7 {
      %c0_10 = arith.constant 0 : index
      %c0_11 = arith.constant 0 : index
      %20 = vector.load %arg2[%c0_10, %c0_11] : memref<128x128xbf16, #tpu.memory_space<vmem>>, vector<128x128xbf16>
      %c0_12 = arith.constant 0 : index
      %c0_13 = arith.constant 0 : index
      %21 = vector.load %arg3[%c0_12, %c0_13] : memref<128x128xbf16, #tpu.memory_space<vmem>>, vector<128x128xbf16>
      %cst_14 = arith.constant dense<0.000000e+00> : vector<128x128xf32>
      %22 = tpu.matmul %20, %21, %cst_14 {dimension_numbers = #tpu.dot_dimension_numbers<[1], [0], [0], [1], [0, 0, 1, 1], [], []>} : vector<128x128xbf16>, vector<128x128xbf16>, vector<128x128xf32> -> vector<128x128xf32>
      %23 = arith.truncf %22 : vector<128x128xf32> to vector<128x128xbf16>
      %24 = arith.index_cast %1 : i32 to index
      %c0_15 = arith.constant 0 : index
      %25 = vector.load %arg7[%24, %c0_15] : memref<384x128xbf16, #tpu.memory_space<vmem>>, vector<128x128xbf16>
      tpu.vector_store %arg7[%24, %c0_15], %23 {strides = array<i32>} : memref<384x128xbf16, #tpu.memory_space<vmem>>, vector<128x128xbf16>,
    } else {
    }
    %8 = arith.index_cast %1 : i32 to index
    %c0 = arith.constant 0 : index
    %9 = vector.load %arg7[%8, %c0] : memref<384x128xbf16, #tpu.memory_space<vmem>>, vector<128x128xbf16>
    %c0_3 = arith.constant 0 : index
    %c0_4 = arith.constant 0 : index
    %10 = vector.load %arg4[%c0_3, %c0_4] : memref<128x128xi8, #tpu.memory_space<vmem>>, vector<128x128xi8>
    %11 = arith.sitofp %10 : vector<128x128xi8> to vector<128x128xf32>
    %12 = arith.truncf %11 : vector<128x128xf32> to vector<128x128xbf16>
    %c0_5 = arith.constant 0 : index
    %c0_6 = arith.constant 0 : index
    %13 = vector.load %arg6[%c0_5, %c0_6] : memref<128x128xf32, #tpu.memory_space<vmem>>, vector<128x128xf32>
    %cst = arith.constant dense<0.000000e+00> : vector<128x128xf32>
    %14 = tpu.matmul %12, %9, %cst {dimension_numbers = #tpu.dot_dimension_numbers<[1], [0], [0], [1], [0, 0, 1, 1], [], []>} : vector<128x128xbf16>, vector<128x128xbf16>, vector<128x128xf32> -> vector<128x128xf32>
    %15 = arith.addf %13, %14 : vector<128x128xf32>
    %c0_7 = arith.constant 0 : index
    %c0_8 = arith.constant 0 : index
    %16 = vector.load %arg6[%c0_7, %c0_8] : memref<128x128xf32, #tpu.memory_space<vmem>>, vector<128x128xf32>
    tpu.vector_store %arg6[%c0_7, %c0_8], %15 {strides = array<i32>} : memref<128x128xf32, #tpu.memory_space<vmem>>, vector<128x128xf32>,
    %c2_i32 = arith.constant 2 : i32
    %17 = arith.cmpi eq, %arg1, %c2_i32 : i32
    %18 = arith.extui %17 : i1 to i32
    %c0_i32_9 = arith.constant 0 : i32
    %19 = arith.cmpi ne, %18, %c0_i32_9 : i32
    scf.if %19 {
      %c0_10 = arith.constant 0 : index
      %c0_11 = arith.constant 0 : index
      %20 = vector.load %arg6[%c0_10, %c0_11] : memref<128x128xf32, #tpu.memory_space<vmem>>, vector<128x128xf32>
      %c0_12 = arith.constant 0 : index
      %c0_13 = arith.constant 0 : index
      %21 = vector.load %arg5[%c0_12, %c0_13] : memref<128x1xf32, #tpu.memory_space<vmem>>, vector<128x1xf32>
      %22 = vector.broadcast %21 : vector<128x1xf32> to vector<128x128xf32>
      %23 = arith.mulf %20, %22 : vector<128x128xf32>
      %c0_14 = arith.constant 0 : index
      %c0_15 = arith.constant 0 : index
      %24 = vector.load %arg6[%c0_14, %c0_15] : memref<128x128xf32, #tpu.memory_space<vmem>>, vector<128x128xf32>
      tpu.vector_store %arg6[%c0_14, %c0_15], %23 {strides = array<i32>} : memref<128x128xf32, #tpu.memory_space<vmem>>, vector<128x128xf32>,
    } else {
    }
    return
  }
  func.func @transform_0(%arg0: i32, %arg1: i32) -> (i32, i32) {
    %c0_i32 = arith.constant 0 : i32
    %0 = arith.cmpi eq, %arg0, %c0_i32 : i32
    %c0_i32_0 = arith.constant 0 : i32
    %1 = arith.select %0, %arg1, %c0_i32_0 : i32
    %c0_i32_1 = arith.constant 0 : i32
    %c0_i32_2 = arith.constant 0 : i32
    return %1, %c0_i32_1 : i32, i32
  }
  func.func @transform_1(%arg0: i32, %arg1: i32) -> (i32, i32) {
    %c0_i32 = arith.constant 0 : i32
    %c0_i32_0 = arith.constant 0 : i32
    %c0_i32_1 = arith.constant 0 : i32
    return %c0_i32, %c0_i32_0 : i32, i32
  }
  func.func @transform_2(%arg0: i32, %arg1: i32) -> (i32, i32) {
    %c0_i32 = arith.constant 0 : i32
    return %arg0, %arg1 : i32, i32
  }
  func.func @transform_3(%arg0: i32, %arg1: i32) -> (i32, i32) {
    %c0_i32 = arith.constant 0 : i32
    %c0_i32_0 = arith.constant 0 : i32
    return %arg0, %c0_i32 : i32, i32
  }
  func.func @transform_4(%arg0: i32, %arg1: i32) -> (i32, i32) {
    %c0_i32 = arith.constant 0 : i32
    %c0_i32_0 = arith.constant 0 : i32
    return %arg0, %c0_i32 : i32, i32
  }
}

</mosaic_0001>

<bundles_post_ra>
// kernel: tpu_custom_call.1
= control target key start
LH: loop header
LB: loop body
LE: loop exit
PB: predicated region body
PF: predicated region fallthrough
CT: control target
= control target key end

     0   :  { %s2001_s0 = inlined_call_operand.hbm [shape: bf16[384,128], index: 0, kind: input, shape index: {}]   ;;  %s2002_s1 = inlined_call_operand.vmem [shape: bf16[128,128], index: 1, kind: input, shape index: {}]   ;;  %s2003_s2 = inlined_call_operand.vmem [shape: s8[384,384], index: 2, kind: input, shape index: {}]   ;;  %s2004_s3 = inlined_call_operand.vmem [shape: f32[384,1], index: 3, kind: input, shape index: {}]   ;;  %s2005_s4 = inlined_call_operand.hbm [shape: f32[384,128], index: 4, kind: output, shape index: {}]  }
   0x1   :  { %2014 = sst [smem:[#allocation16_spill]] %s2001_s0 }
   0x2   :  { %2015 = sst [smem:[#allocation17_spill]] %s2002_s1 }
   0x3   :  { %2016 = sst [smem:[#allocation18_spill]] %s2005_s4 }
   0x4   :  { %9 = vsyncpa [#allocation4], 0 }
   0x5   :  { %11 = vsyncpa [#allocation4 + $0x1], 0 }
   0x6   :  { %12 = vsyncpa [#allocation5], 0 }
   0x7   :  { %14 = vsyncpa [#allocation5 + $0x1], 0  ;;  %s1567_s15 = smov 0   ;;  %s1569_s16 = smov 0  }
   0x8   :  { %s1571_s17 = smov 0   ;;  %s1573_s18 = smov 0  }
   0x9   :  { %s1575_s19 = smov 0   ;;  %s1577_s20 = smov 0  }
   0xa   :  { %s1579_s21 = smov 0   ;;  %s1581_s22 = smov 0  }
   0xb   :  { %s1583_s23 = smov 0   ;;  %s1585_s24 = smov 0  }
   0xc   :  { %s1587_s25 = smov 0   ;;  %s1589_s26 = smov 0  }
   0xd   :  { %s1591_s27 = smov 0  }
   0xe LB: > { %2017 = sst [smem:[#allocation10_spill]] %s1512_s22  ;;  %s2006_s28 = sadd.s32 4294967295, %s1532_s27   ;;  %s1532_s27 = sphi %s1591_s27, %s20_s27   ;;  %s1528_s26 = sphi %s1589_s26, %s2053_s26   ;;  %s1524_s25 = sphi %s1587_s25, %s2052_s25   ;;  %s1520_s24 = sphi %s1585_s24, %s2051_s24   ;;  %s1516_s23 = sphi %s1583_s23, %s2050_s23   ;;  %s1512_s22 = sphi %s1581_s22, %s2040_s22   ;;  %s1508_s21 = sphi %s1579_s21, %s2049_s21   ;;  %s1504_s20 = sphi %s1577_s20, %s2048_s20   ;;  %s1500_s19 = sphi %s1575_s19, %s2047_s19   ;;  %s1496_s18 = sphi %s1573_s18, %s2046_s18   ;;  %s1492_s17 = sphi %s1571_s17, %s2045_s17   ;;  %s1488_s16 = sphi %s1569_s16, %s2044_s16   ;;  %s1484_s15 = sphi %s1567_s15, %s2043_s15  }
   0xf   : > { %s29_s30 = sadd.s32 1, %s1524_s25  ;;  %s32_s5 = sadd.s32 1, %s1528_s26 }
  0x10   : > { %p30_p0 = scmp.ge.s32.totalorder %s29_s30, 3  ;;  %p36_p1 = scmp.eq.s32.totalorder %s1528_s26, 0 }
  0x11   : > { %s43_s6 = sadd.s32 1, %s1512_s22  ;;  %p50_p2 = scmp.ne.s32.totalorder %s1512_s22, %s1508_s21 }
  0x12   : > { %s2055_s30 = smov (%p30_p0, %s29_s30), 0  ;;  %s2057_s5 = smov (!%p30_p0, %s32_s5), %s1528_s26 }
  0x13   : > { %2018 = sst [smem:[#allocation11_spill]] %s2055_s30  ;;  %p34_p3 = scmp.ge.s32.totalorder %s2057_s5, 3 }
  0x14   : > { %s1642_s7 = scalar_select %p36_p1, %s1524_s25, 0 }
  0x15   : > { %p51_p4 = scmp.eq.s32.totalorder %s1532_s27, 0  ;;  %p56_p5 = scmp.ne.s32.totalorder %s1508_s21, %s1504_s20 }
  0x16   : > { %p57_p6 = scmp.eq.s32.totalorder %s2006_s28, 0  ;;  %s2059_s5 = smov (%p34_p3, %s2057_s5), 0 }
  0x17   : > { %2019 = sst [smem:[#allocation12_spill]] %s2059_s5  ;;  %p1652_p7 = por %p51_p4, %p50_p2 }
  0x18   : > { %p1656_p8 = por %p57_p6, %p56_p5  ;;  %p38_p9 = scmp.eq.s32.totalorder %s2059_s5, 0 }
  0x19   : > { %s87_s10 = ssub.s32 %s1528_s26, %s2059_s5  ;;  %s88_s11 = ssub.s32 %s1524_s25, %s2055_s30 }
  0x1a   : > { %s2021_s9 = scalar_select %p1656_p8, 1, 0 }
  0x1b   : > { %s92_s12 = sadd.s32 1, %s1500_s19  ;;  %s89_s14 = sor.u32 %s88_s11, %s87_s10 }
  0x1c   : > { %s39_s13 = scalar_select %p38_p9, %s2055_s30, 0 }
  0x1d   : > { %p99_p10 = scmp.ne.s32.totalorder %s1500_s19, %s1496_s18  ;;  %p90_p11 = scmp.eq.s32.totalorder %s89_s14, 0 }
  0x1e   : > { %s40_s20 = ssub.s32 %s1642_s7, %s39_s13  ;;  %p142_p0 = scmp.eq.s32.totalorder %s87_s10, 0 }
  0x1f   : > { %p41_p12 = scmp.eq.s32.totalorder %s40_s20, 0  ;;  %p1672_p13 = por %p99_p10, %p51_p4 }
  0x20   : > { %s1677_s28 = scalar_select %p90_p11, %s1500_s19, %s92_s12  }
  0x21   : > { %s1680_s5 = scalar_select %p41_p12, %s1512_s22, %s43_s6  }
  0x22   : > { %2023 = sst [smem:[#allocation13_spill]] %s1677_s28  ;;  %s144_s4 = sadd.s32 1, %s1492_s17 }
  0x23   : > { %2024 = sst [smem:[#allocation14_spill]] %s1680_s5  ;;  %p154_p1 = scmp.ne.s32.totalorder %s1492_s17, %s1488_s16 }
  0x24   : > { %s2025_s1 = sadd.s32 4294967295, %s1532_s27   ;;  %p160_p5 = scmp.ne.s32.totalorder %s1488_s16, %s1484_s15 }
  0x25   : > { %p155_p2 = scmp.eq.s32.totalorder %s2025_s1, 8  ;;  %s2028_s13 = sadd.s32 4294967294, %s1532_s27  }
  0x26   : > { %s1688_s30 = scalar_select %p142_p0, %s1492_s17, %s144_s4  }
  0x27   : > { %p1690_p3 = por %p155_p2, %p154_p1  ;;  %p161_p4 = scmp.eq.s32.totalorder %s2028_s13, 8 }
  0x28   : > { %2026 = sst [smem:[#allocation15_spill]] %s1688_s30  ;;  %p1057_p9 = scmp.ge.s32.totalorder %s1532_s27, 9 }
  0x29   : > { %s2027_s11 = scalar_select %p1690_p3, 1, 0 }
  0x2a   : > { %p1698_p6 = por %p161_p4, %p160_p5  ;;  %180 = sbr.rel (%p1057_p9) target bundleno = 83 (0x53), region = 20 }
  0x2b   : > { %s184_s1 = sand.u32 (!%p1057_p9), 1, %s1512_s22   ;;  %s1098_s4 = sshll.u32 (!%p1057_p9), %s1642_s7, 10 }
  0x2c   : > { %s2029_s14 = scalar_select %p1698_p6, 1, 0 }
  0x2d   : > { %s1058_s6 = sshll.u32 (!%p1057_p9), %s184_s1, 6  ;;  %s2030_s0 = sld [smem:[#allocation16_spill]] (!%p1057_p9) }
  0x2e   : > { %s188_s13 = scalar_lea.vmem (!%p1057_p9), [#allocation3], %s1058_s6  ;;  %s1712_s28 = scalar_lea.sflag (!%p1057_p9), [#allocation4], %s184_s1 }
  0x2f   : > { %s197_s5 = sshll.u32 (!%p1057_p9), %s188_s13, 4  ;;  %s1710_s5 = int_to_ptr.vmem [resolvable:$true] %s197_s5 }
  0x33   : > { %s1708_s20 = scalar_lea.hbm %s2030_s0, %s1098_s4  ;;  %s1370_s4 = scalar_lea.hbm %s2030_s0, 3072 }
  0x34   : > { %s1366_s30 = scalar_lea.hbm %s1708_s20, 1024  ;;  %p1371_p0 = scmp.lt.u32.totalorder %s1708_s20, %s2030_s0 }
  0x35   : > { %p1367_p10 = scmp.ne.s32.totalorder %s1708_s20, %s1366_s30  ;;  %p1372_p1 = scmp.lt.u32.totalorder %s1370_s4, %s1366_s30 }
  0x36   : > { %p1374_p5 = scmp.lt.u32.totalorder %s1366_s30, %s1708_s20 }
  0x37   : > { %p1368_p11 = pnand %p1367_p10, %p1652_p7  ;;  %p1373_p2 = por %p1372_p1, %p1371_p0 }
  0x39   : > { %p1369_p12 = pneg %p1368_p11  ;;  %p1375_p4 = por %p1374_p5, %p1373_p2 }
  0x3b   : > { %p1376_p9 = pnand %p1375_p4, %p1369_p12 }
  0x3d   : > { %1379 = shalt.err (!%p1376_p9)
}
  0x3e   : > { %s1380_s1 = scalar_lea.vmem %s1710_s5, 1024  ;;  %s1534_s22 = smov [#allocation3]  }
  0x3f   : > { %p1381_p10 = scmp.ne.s32.totalorder %s1710_s5, %s1380_s1  ;;  %s1384_s6 = sshll.u32 %s1534_s22, 4  ;;  %s1385_s6 = int_to_ptr.vmem [resolvable:$false] %s1384_s6 }
  0x40   : > { %s1386_s13 = scalar_lea.vmem %s1385_s6, 2048  ;;  %p1387_p3 = scmp.lt.s32.totalorder %s1710_s5, %s1385_s6 }
  0x41   : > { %p1382_p11 = pnand %p1381_p10, %p1652_p7  ;;  %p1388_p8 = scmp.lt.s32.totalorder %s1386_s13, %s1380_s1 }
  0x43   : > { %p1383_p6 = pneg %p1382_p11  ;;  %p1389_p0 = por %p1388_p8, %p1387_p3 }
  0x45   : > { %p1390_p1 = pnand %p1389_p0, %p1383_p6 }
  0x47   : > { %1393 = shalt.err (!%p1390_p1)
}
  0x48   : > { %s1535_s30 = smov 64   ;;  %s1536_s7 = smov 4  }
  0x49   : > { %1229 = dma.hbm_to_vmem [thread:$0]  (%p1652_p7), %s1708_s20, 1024, %s1710_s5, %s1712_s28, %s1535_s30, %s1535_s30, %s1536_s7  }
  0x4a   : > { %206 = sbr.rel (!%p1672_p13) target bundleno = 83 (0x53), region = 28  ;;  %s208_s4 = sand.u32 (%p1672_p13), 1, %s1500_s19  }
  0x4b   : > { %s1228_s10 = smul.u32 (%p1672_p13), 12, %s1528_s26  ;;  %s1061_s12 = sshll.u32 (%p1672_p13), %s208_s4, 5 }
  0x4c   : > { %s210_s8 = scalar_lea.vmem (%p1672_p13), [#allocation6], %s1061_s12 }
  0x4d   : > { %s213_s1 = sadd.s32 (%p1672_p13), %s1524_s25, %s1228_s10 }
  0x4e   : > { %s1064_s22 = sshll.u32 (%p1672_p13), %s213_s1, 3 }
  0x4f   : > { %s215_s0 = scalar_lea.vmem (%p1672_p13), %s2003_s2, %s1064_s22 }
  0x50   : > { %v249_v0 = vld [vmem:[%s215_s0] sm:$0xff] (%p1672_p13)  ;;  %v251_v1 = vld [vmem:[%s215_s0 + $0x18] sm:$0xff] (%p1672_p13)  ;;  %v253_v2 = vld [vmem:[%s215_s0 + $0x30] sm:$0xff] (%p1672_p13) }
  0x51   : > { %250 = vst [vmem:[%s210_s8] sm:$0xff] %v249_v0  ;;  %252 = vst [vmem:[%s210_s8 + $0x8] sm:$0xff] %v251_v1  ;;  %v255_v3 = vld [vmem:[%s215_s0 + $0x48] sm:$0xff] }
  0x52   : > { %254 = vst [vmem:[%s210_s8 + $0x10] sm:$0xff] %v253_v2  ;;  %256 = vst [vmem:[%s210_s8 + $0x18] sm:$0xff] %v255_v3 }
  0x53 PF: > { %p1065_p7 = scmp.ge.s32.totalorder %s1532_s27, 1  ;;  %p270_p8 = scmp.lt.s32.totalorder %s1532_s27, 10 }
  0x55   : > { %p271_p13 = pnand %p1065_p7, %p270_p8 }
  0x56   : > { %s276_s28 = sand.u32 (!%p271_p13), 1, %s1508_s21   ;;  %p2031_p3 = scmp.ne.s32.totalorder (!%p271_p13), %s2021_s9, 0 }
  0x57   : > { %274 = sbr.rel (%p271_p13) target bundleno = 785 (0x311), region = 70  ;;  %s1066_s29 = sshll.u32 (!%p271_p13), %s276_s28, 6 }
  0x58   : > { %s277_s5 = scalar_lea.sflag (!%p271_p13), [#allocation4], %s276_s28  ;;  %s1747_s20 = scalar_lea.vmem (!%p271_p13), [#allocation3], %s1066_s29 }
  0x5e   : > { %1475 = dma.done.wait (%p2031_p3), %s277_s5, 1024  }
  0x5f   : > { %1477 = vsyncadd (%p2031_p3), %s277_s5, 4294966272  ;;  %s286_s0 = sand.u32 1, %s1496_s18   ;;  %s318_s30 = sand.u32 1, %s1488_s16  }
  0x60   : > { %s1067_s7 = sshll.u32 %s286_s0, 5  ;;  %s1068_s4 = sshll.u32 %s318_s30, 7 }
  0x61   : > { %s1069_s10 = sshll.u32 %s1520_s24, 4  ;;  %s1071_s12 = sshll.u32 %s1516_s23, 7 }
  0x62   : > { %p326_p6 = scmp.lt.s32.totalorder %s1069_s10, 47  ;;  %s1764_s13 = scalar_lea.vmem [#allocation6], %s1067_s7 }
  0x63   : > { %s1766_s8 = scalar_lea.vmem [#allocation7], %s1068_s4  ;;  %p1072_p12 = scmp.ne.s32.totalorder %s1516_s23, 0 }
  0x64   : > { %s2061_s10 = smov (!%p326_p6, %s1069_s10), 47  ;;  %v1537_v4 = vmov (!%p1072_p12), 0.0  }
  0x65   : > { %s1070_s1 = sshll.u32 %s2061_s10, 3  ;;  %337 = sbr.rel (%p1072_p12) target bundleno = 109 (0x6d), region = 82  ;;  %338 = vst [vmem:[%s1766_s8] sm:$0xff] (!%p1072_p12), %v1537_v4  ;;  %339 = vst [vmem:[%s1766_s8 + $0x8] sm:$0xff] (!%p1072_p12), %v1537_v4 }
  0x66   : > { %s1762_s9 = scalar_lea.vmem %s2004_s3, %s1070_s1  ;;  %340 = vst [vmem:[%s1766_s8 + $0x10] sm:$0xff] (!%p1072_p12), %v1537_v4  ;;  %341 = vst [vmem:[%s1766_s8 + $0x18] sm:$0xff] (!%p1072_p12), %v1537_v4 }
  0x67   : > { %342 = vst [vmem:[%s1766_s8 + $0x20] sm:$0xff] (!%p1072_p12), %v1537_v4  ;;  %343 = vst [vmem:[%s1766_s8 + $0x28] sm:$0xff] (!%p1072_p12), %v1537_v4 }
  0x68   : > { %344 = vst [vmem:[%s1766_s8 + $0x30] sm:$0xff] (!%p1072_p12), %v1537_v4  ;;  %345 = vst [vmem:[%s1766_s8 + $0x38] sm:$0xff] (!%p1072_p12), %v1537_v4 }
  0x69   : > { %346 = vst [vmem:[%s1766_s8 + $0x40] sm:$0xff] (!%p1072_p12), %v1537_v4  ;;  %347 = vst [vmem:[%s1766_s8 + $0x48] sm:$0xff] (!%p1072_p12), %v1537_v4 }
  0x6a   : > { %348 = vst [vmem:[%s1766_s8 + $0x50] sm:$0xff] (!%p1072_p12), %v1537_v4  ;;  %349 = vst [vmem:[%s1766_s8 + $0x58] sm:$0xff] (!%p1072_p12), %v1537_v4 }
  0x6b   : > { %350 = vst [vmem:[%s1766_s8 + $0x60] sm:$0xff] (!%p1072_p12), %v1537_v4  ;;  %351 = vst [vmem:[%s1766_s8 + $0x68] sm:$0xff] (!%p1072_p12), %v1537_v4 }
  0x6c   : > { %352 = vst [vmem:[%s1766_s8 + $0x70] sm:$0xff] %v1537_v4  ;;  %353 = vst [vmem:[%s1766_s8 + $0x78] sm:$0xff] %v1537_v4 }
  0x6d PF: > { %p1073_p2 = scmp.ne.s32.totalorder %s1520_s24, 0 }
  0x6e   : > { %s2032_s29 = sld [smem:[#allocation17_spill]] (!%p1073_p2)  ;;  %v1356_v9 = vld [vmem:[%s1747_s20] sm:$0xff] (!%p1073_p2)   ;;  %v1358_v15 = vld [vmem:[%s1747_s20 + $0x8] sm:$0xff] (!%p1073_p2)   ;;  %v1360_v17 = vld [vmem:[%s1747_s20 + $0x10] sm:$0xff] (!%p1073_p2)   ;;  %s591_s10 = sshra.s32 (!%p1073_p2), %s1071_s12, 4 }
  0x6f   : > { %357 = sbr.rel (%p1073_p2) target bundleno = 375 (0x177), region = 86  ;;  %v1357_v10 = vld [vmem:[%s1747_s20 + $0x20] sm:$0xff] (!%p1073_p2)   ;;  %1148 = vmatprep.mubr.bf16.mxu0 (!%p1073_p2), %v1356_v9  ;;  %v1359_v16 = vld [vmem:[%s1747_s20 + $0x28] sm:$0xff] (!%p1073_p2)   ;;  %v1361_v18 = vld [vmem:[%s1747_s20 + $0x30] sm:$0xff] (!%p1073_p2)   ;;  %s1090_s1 = sshll.u32 (!%p1073_p2), %s591_s10, 3 }
  0x70   : > { %1156 = vmatprep.mubr.bf16.mxu1 (!%p1073_p2), %v1357_v10  ;;  %v1362_v19 = vld [vmem:[%s1747_s20 + $0x18] sm:$0xff] (!%p1073_p2)   ;;  %s594_s22 = scalar_lea.vmem (!%p1073_p2), [#allocation2], %s1090_s1 }
  0x71   : > { %v1363_v20 = vld [vmem:[%s1747_s20 + $0x38] sm:$0xff] (!%p1073_p2)  }
  0x74   : > { %v1348_v5 = vld [vmem:[%s2032_s29] sm:$0xff] (!%p1073_p2)   ;;  %v1349_v6 = vld [vmem:[%s2032_s29 + $0x8] sm:$0xff] (!%p1073_p2)   ;;  %v1350_v7 = vld [vmem:[%s2032_s29 + $0x10] sm:$0xff] (!%p1073_p2)  }
  0x75   : > { %1132 = vmatprep.subr.bf16.mxu0 (!%p1073_p2), %v1348_v5  ;;  %1196 = vmatprep.subr.bf16.mxu1 (!%p1073_p2), %v1348_v5  ;;  %v1351_v8 = vld [vmem:[%s2032_s29 + $0x18] sm:$0xff] (!%p1073_p2)   ;;  %v1352_v11 = vld [vmem:[%s2032_s29 + $0x20] sm:$0xff] (!%p1073_p2)   ;;  %v1353_v12 = vld [vmem:[%s2032_s29 + $0x28] sm:$0xff] (!%p1073_p2)  }
  0x76   : > { %1133 = vmatpush3.bf16.msra.mxu0 %v1348_v5  ;;  %1204 = vmatpush3.bf16.msra.mxu1 %v1348_v5  ;;  %v1354_v13 = vld [vmem:[%s2032_s29 + $0x30] sm:$0xff]   ;;  %v1355_v14 = vld [vmem:[%s2032_s29 + $0x38] sm:$0xff]  }
  0x77   : > { %1134 = vmatprep.subr.bf16.mxu0 %v1349_v6  ;;  %1197 = vmatprep.subr.bf16.mxu1 %v1349_v6 }
  0x7a   : > { %1135 = vmatpush3.bf16.msra.mxu0 %v1349_v6  ;;  %1205 = vmatpush3.bf16.msra.mxu1 %v1349_v6 }
  0x7b   : > { %1136 = vmatprep.subr.bf16.mxu0 %v1350_v7  ;;  %1198 = vmatprep.subr.bf16.mxu1 %v1350_v7 }
  0x7e   : > { %1137 = vmatpush3.bf16.msra.mxu0 %v1350_v7  ;;  %1206 = vmatpush3.bf16.msra.mxu1 %v1350_v7 }
  0x7f   : > { %1138 = vmatprep.subr.bf16.mxu0 %v1351_v8  ;;  %1199 = vmatprep.subr.bf16.mxu1 %v1351_v8 }
  0x82   : > { %1139 = vmatpush3.bf16.msra.mxu0 %v1351_v8  ;;  %1207 = vmatpush3.bf16.msra.mxu1 %v1351_v8 }
  0x83   : > { %1140 = vmatprep.subr.bf16.mxu0 %v1352_v11  ;;  %1200 = vmatprep.subr.bf16.mxu1 %v1352_v11 }
  0x86   : > { %1141 = vmatpush3.bf16.msra.mxu0 %v1352_v11  ;;  %1208 = vmatpush3.bf16.msra.mxu1 %v1352_v11 }
  0x87   : > { %1142 = vmatprep.subr.bf16.mxu0 %v1353_v12  ;;  %1201 = vmatprep.subr.bf16.mxu1 %v1353_v12 }
  0x8a   : > { %1143 = vmatpush3.bf16.msra.mxu0 %v1353_v12  ;;  %1209 = vmatpush3.bf16.msra.mxu1 %v1353_v12 }
  0x8b   : > { %1144 = vmatprep.subr.bf16.mxu0 %v1354_v13  ;;  %1202 = vmatprep.subr.bf16.mxu1 %v1354_v13 }
  0x8e   : > { %1145 = vmatpush3.bf16.msra.mxu0 %v1354_v13  ;;  %1210 = vmatpush3.bf16.msra.mxu1 %v1354_v13 }
  0x8f   : > { %1146 = vmatprep.subr.bf16.mxu0 %v1355_v14  ;;  %1203 = vmatprep.subr.bf16.mxu1 %v1355_v14 }
  0x92   : > { %1147 = vmatpush3.bf16.msra.mxu0 %v1355_v14  ;;  %1211 = vmatpush3.bf16.msra.mxu1 %v1355_v14 }
  0x95   : > { %1149 = vmatmul.mubr.bf16.vlgmr.msra.gmra.mrb[0].mxu0 %v1358_v15  ;;  %1157 = vmatmul.mubr.bf16.vlgmr.msra.gmra.mrb[0].mxu1 %v1359_v16 }
  0x96   : > { %1152 = vmatprep.mubr.bf16.mxu0 %v1360_v17  ;;  %1160 = vmatprep.mubr.bf16.mxu1 %v1361_v18 }
  0x9d   : > { %1153 = vmatmul.mubr.bf16.gmra.mrb[4].mxu0 %v1362_v19  ;;  %1161 = vmatmul.mubr.bf16.gmra.mrb[4].mxu1 %v1363_v20 }
 0x168   : > { %v1150_v21 = vpop.f32.mrb[0].mxu0  ;;  %v1158_v22 = vpop.f32.mrb[0].mxu1 }
 0x169   : > { %v520_v23 = vpop.f32.mrb[1].mxu0  ;;  %v552_v24 = vpop.f32.mrb[1].mxu1 }
 0x16a   : > { %v1151_v25 = vpop.f32.mrb[2].mxu0  ;;  %v1159_v26 = vpop.f32.mrb[2].mxu1 }
 0x16b   : > { %v584_v27 = vpack.c.bf16 %v1151_v25, %v1150_v21  ;;  %v588_v28 = vpack.c.bf16 %v1159_v26, %v1158_v22  ;;  %v523_v29 = vpop.f32.mrb[3].mxu0  ;;  %v555_v30 = vpop.f32.mrb[3].mxu1 }
 0x16c   : > { %v583_v31 = vpack.c.bf16 %v523_v29, %v520_v23  ;;  %v587_v32 = vpack.c.bf16 %v555_v30, %v552_v24 }
 0x16d   : > { %596 = vst [vmem:[%s594_s22 + $0x8] sm:$0xff] %v584_v27  ;;  %600 = vst [vmem:[%s594_s22 + $0x28] sm:$0xff] %v588_v28 }
 0x16e   : > { %595 = vst [vmem:[%s594_s22] sm:$0xff] %v583_v31  ;;  %599 = vst [vmem:[%s594_s22 + $0x20] sm:$0xff] %v587_v32 }
 0x170   : > { %v1154_v33 = vpop.f32.mrb[4].mxu0  ;;  %v1162_v34 = vpop.f32.mrb[4].mxu1 }
 0x171   : > { %v536_v35 = vpop.f32.mrb[5].mxu0  ;;  %v568_v36 = vpop.f32.mrb[5].mxu1 }
 0x172   : > { %v1155_v37 = vpop.f32.mrb[6].mxu0  ;;  %v1163_v38 = vpop.f32.mrb[6].mxu1 }
 0x173   : > { %v586_v39 = vpack.c.bf16 %v1155_v37, %v1154_v33  ;;  %v590_v40 = vpack.c.bf16 %v1163_v38, %v1162_v34  ;;  %v539_v41 = vpop.f32.mrb[7].mxu0  ;;  %v571_v42 = vpop.f32.mrb[7].mxu1 }
 0x174   : > { %v585_v43 = vpack.c.bf16 %v539_v41, %v536_v35  ;;  %v589_v44 = vpack.c.bf16 %v571_v42, %v568_v36 }
 0x175   : > { %598 = vst [vmem:[%s594_s22 + $0x18] sm:$0xff] %v586_v39  ;;  %602 = vst [vmem:[%s594_s22 + $0x38] sm:$0xff] %v590_v40 }
 0x176   : > { %597 = vst [vmem:[%s594_s22 + $0x10] sm:$0xff] %v585_v43  ;;  %601 = vst [vmem:[%s594_s22 + $0x30] sm:$0xff] %v589_v44 }
 0x177 PF: > { %s603_s20 = sshra.s32 %s1071_s12, 4  ;;  %v615_v45 = vld [vmem:[%s1764_s13] sm:$0xff]  ;;  %v617_v46 = vld [vmem:[%s1764_s13 + $0x10] sm:$0xff]  ;;  %v616_v57 = vld [vmem:[%s1764_s13 + $0x8] sm:$0xff]  ;;  %p1092_p5 = scmp.ne.s32.totalorder %s1516_s23, 2 }
 0x178   : > { %s1091_s6 = sshll.u32 %s603_s20, 3  ;;  %v619_v47 = vunpack.c.l.s8.bf16 %v615_v45  ;;  %v623_v48 = vunpack.c.l.s8.bf16 %v617_v46  ;;  %v618_v58 = vld [vmem:[%s1764_s13 + $0x18] sm:$0xff]  ;;  %v620_v59 = vunpack.c.h.s8.bf16 %v615_v45  ;;  %v624_v60 = vunpack.c.h.s8.bf16 %v617_v46  ;;  %v629_v1 = vld [vmem:[%s1766_s8 + $0x10] sm:$0xff]  ;;  %v627_v3 = vld [vmem:[%s1766_s8] sm:$0xff] }
 0x179   : > { %s1824_s18 = scalar_lea.vmem [#allocation2], %s1091_s6  ;;  %v621_v61 = vunpack.c.l.s8.bf16 %v616_v57  ;;  %v625_v62 = vunpack.c.l.s8.bf16 %v618_v58  ;;  %v622_v63 = vunpack.c.h.s8.bf16 %v616_v57  ;;  %v626_v0 = vunpack.c.h.s8.bf16 %v618_v58  ;;  %v637_v2 = vld [vmem:[%s1766_s8 + $0x50] sm:$0xff]  ;;  %v635_v4 = vld [vmem:[%s1766_s8 + $0x40] sm:$0xff]  ;;  %v630_v7 = vld [vmem:[%s1766_s8 + $0x18] sm:$0xff] }
 0x17a   : > { %1180 = vmatprep.mubr.bf16.mxu0 %v619_v47  ;;  %1188 = vmatprep.mubr.bf16.mxu1 %v623_v48  ;;  %v638_v8 = vld [vmem:[%s1766_s8 + $0x58] sm:$0xff]  ;;  %v628_v13 = vld [vmem:[%s1766_s8 + $0x8] sm:$0xff]  ;;  %v633_v25 = vld [vmem:[%s1766_s8 + $0x30] sm:$0xff] }
 0x17b   : > { %v636_v14 = vld [vmem:[%s1766_s8 + $0x48] sm:$0xff]  ;;  %v641_v26 = vld [vmem:[%s1766_s8 + $0x70] sm:$0xff]  ;;  %v631_v27 = vld [vmem:[%s1766_s8 + $0x20] sm:$0xff] }
 0x17c   : > { %v639_v28 = vld [vmem:[%s1766_s8 + $0x60] sm:$0xff]  ;;  %v634_v31 = vld [vmem:[%s1766_s8 + $0x38] sm:$0xff]  ;;  %v632_v37 = vld [vmem:[%s1766_s8 + $0x28] sm:$0xff] }
 0x17d   : > { %v607_v49 = vld [vmem:[%s1824_s18] sm:$0xff]  ;;  %v608_v50 = vld [vmem:[%s1824_s18 + $0x8] sm:$0xff]  ;;  %v609_v51 = vld [vmem:[%s1824_s18 + $0x10] sm:$0xff] }
 0x17e   : > { %1164 = vmatprep.subr.bf16.mxu0 %v607_v49  ;;  %1212 = vmatprep.subr.bf16.mxu1 %v607_v49  ;;  %v610_v52 = vld [vmem:[%s1824_s18 + $0x18] sm:$0xff]  ;;  %v611_v53 = vld [vmem:[%s1824_s18 + $0x20] sm:$0xff]  ;;  %v612_v54 = vld [vmem:[%s1824_s18 + $0x28] sm:$0xff] }
 0x17f   : > { %1165 = vmatpush3.bf16.msra.mxu0 %v607_v49  ;;  %1220 = vmatpush3.bf16.msra.mxu1 %v607_v49  ;;  %v613_v55 = vld [vmem:[%s1824_s18 + $0x30] sm:$0xff]  ;;  %v614_v56 = vld [vmem:[%s1824_s18 + $0x38] sm:$0xff]  ;;  %v640_v38 = vld [vmem:[%s1766_s8 + $0x68] sm:$0xff] }
 0x180   : > { %1166 = vmatprep.subr.bf16.mxu0 %v608_v50  ;;  %1213 = vmatprep.subr.bf16.mxu1 %v608_v50  ;;  %v642_v32 = vld [vmem:[%s1766_s8 + $0x78] sm:$0xff]  ;;  %v794_v49 = vld [vmem:[%s1762_s9 + $0x10] sm:$0xff] (!%p1092_p5)  ;;  %v801_v58 = vld [vmem:[%s1762_s9 + $0x48] sm:$0xff] (!%p1092_p5) }
 0x181   : > { %v798_v57 = vld [vmem:[%s1762_s9 + $0x30] sm:$0xff] (!%p1092_p5) }
 0x183   : > { %1167 = vmatpush3.bf16.msra.mxu0 %v608_v50  ;;  %1221 = vmatpush3.bf16.msra.mxu1 %v608_v50  ;;  %v792_v50 = vld [vmem:[%s1762_s9] sm:$0xff] (!%p1092_p5) }
 0x184   : > { %1168 = vmatprep.subr.bf16.mxu0 %v609_v51  ;;  %1214 = vmatprep.subr.bf16.mxu1 %v609_v51 }
 0x187   : > { %1169 = vmatpush3.bf16.msra.mxu0 %v609_v51  ;;  %1222 = vmatpush3.bf16.msra.mxu1 %v609_v51  ;;  %v1538_v51 = vmov (!%p1092_p5), 0  }
 0x188   : > { %1170 = vmatprep.subr.bf16.mxu0 %v610_v52  ;;  %1215 = vmatprep.subr.bf16.mxu1 %v610_v52 }
 0x189   : > { %1365 = vset.pattern.permute.xlu1 (!%p1092_p5), %v1538_v51  ;;  %1364 = vset.pattern.permute.xlu0 (!%p1092_p5), %v1538_v51 }
 0x18a   : > { %820 = vperm.xlu1 (!%p1092_p5), %1365, %v794_v49   ;;  %810 = vperm.xlu0 (!%p1092_p5), %1364, %v792_v50  }
 0x18b   : > { %1171 = vmatpush3.bf16.msra.mxu0 %v610_v52  ;;  %1223 = vmatpush3.bf16.msra.mxu1 %v610_v52  ;;  %v795_v52 = vld [vmem:[%s1762_s9 + $0x18] sm:$0xff] (!%p1092_p5) }
 0x18c   : > { %1172 = vmatprep.subr.bf16.mxu0 %v611_v53  ;;  %1216 = vmatprep.subr.bf16.mxu1 %v611_v53 }
 0x18e   : > { %825 = vperm.xlu1 (!%p1092_p5), %1365, %v795_v52  }
 0x18f   : > { %1173 = vmatpush3.bf16.msra.mxu0 %v611_v53  ;;  %1224 = vmatpush3.bf16.msra.mxu1 %v611_v53  ;;  %v793_v53 = vld [vmem:[%s1762_s9 + $0x8] sm:$0xff] (!%p1092_p5) }
 0x190   : > { %1174 = vmatprep.subr.bf16.mxu0 %v612_v54  ;;  %1217 = vmatprep.subr.bf16.mxu1 %v612_v54 }
 0x191   : > { %815 = vperm.xlu0 (!%p1092_p5), %1364, %v793_v53  }
 0x193   : > { %1175 = vmatpush3.bf16.msra.mxu0 %v612_v54  ;;  %1225 = vmatpush3.bf16.msra.mxu1 %v612_v54  ;;  %v797_v54 = vld [vmem:[%s1762_s9 + $0x28] sm:$0xff] (!%p1092_p5) }
 0x194   : > { %1176 = vmatprep.subr.bf16.mxu0 %v613_v55  ;;  %1218 = vmatprep.subr.bf16.mxu1 %v613_v55 }
 0x195   : > { %835 = vperm.xlu1 (!%p1092_p5), %1365, %v797_v54  }
 0x197   : > { %1177 = vmatpush3.bf16.msra.mxu0 %v613_v55  ;;  %1226 = vmatpush3.bf16.msra.mxu1 %v613_v55  ;;  %v796_v55 = vld [vmem:[%s1762_s9 + $0x20] sm:$0xff] (!%p1092_p5) }
 0x198   : > { %1178 = vmatprep.subr.bf16.mxu0 %v614_v56  ;;  %1219 = vmatprep.subr.bf16.mxu1 %v614_v56 }
 0x199   : > { %830 = vperm.xlu0 (!%p1092_p5), %1364, %v796_v55  }
 0x19b   : > { %1179 = vmatpush3.bf16.msra.mxu0 %v614_v56  ;;  %1227 = vmatpush3.bf16.msra.mxu1 %v614_v56  ;;  %v799_v56 = vld [vmem:[%s1762_s9 + $0x38] sm:$0xff] (!%p1092_p5) }
 0x19c   : > { %845 = vperm.xlu1 (!%p1092_p5), %1365, %v799_v56  }
 0x19d   : > { %840 = vperm.xlu0 (!%p1092_p5), %1364, %v798_v57  }
 0x19e   : > { %1181 = vmatmul.mubr.bf16.vlgmr.msra.gmra.mrb[0].mxu0 %v620_v59  ;;  %1189 = vmatmul.mubr.bf16.vlgmr.msra.gmra.mrb[0].mxu1 %v624_v60  ;;  %v800_v59 = vld [vmem:[%s1762_s9 + $0x40] sm:$0xff] (!%p1092_p5)  ;;  %v803_v60 = vld [vmem:[%s1762_s9 + $0x58] sm:$0xff] (!%p1092_p5) }
 0x19f   : > { %1184 = vmatprep.mubr.bf16.mxu0 %v621_v61  ;;  %1192 = vmatprep.mubr.bf16.mxu1 %v625_v62  ;;  %v802_v61 = vld [vmem:[%s1762_s9 + $0x50] sm:$0xff] (!%p1092_p5)  ;;  %v805_v62 = vld [vmem:[%s1762_s9 + $0x68] sm:$0xff] (!%p1092_p5) }
 0x1a0   : > { %855 = vperm.xlu1 (!%p1092_p5), %1365, %v801_v58  }
 0x1a1   : > { %850 = vperm.xlu0 (!%p1092_p5), %1364, %v800_v59  }
 0x1a4   : > { %865 = vperm.xlu1 (!%p1092_p5), %1365, %v803_v60  }
 0x1a5   : > { %860 = vperm.xlu0 (!%p1092_p5), %1364, %v802_v61  }
 0x1a6   : > { %1185 = vmatmul.mubr.bf16.gmra.mrb[4].mxu0 %v622_v63  ;;  %1193 = vmatmul.mubr.bf16.gmra.mrb[4].mxu1 %v626_v0  ;;  %v804_v63 = vld [vmem:[%s1762_s9 + $0x60] sm:$0xff] (!%p1092_p5)  ;;  %v807_v0 = vld [vmem:[%s1762_s9 + $0x78] sm:$0xff] (!%p1092_p5) }
 0x1a8   : > { %875 = vperm.xlu1 (!%p1092_p5), %1365, %v805_v62  }
 0x1a9   : > { %870 = vperm.xlu0 (!%p1092_p5), %1364, %v804_v63  }
 0x1ac   : > { %885 = vperm.xlu1 (!%p1092_p5), %1365, %v807_v0  }
 0x271   : > { %v1182_v5 = vpop.f32.mrb[0].mxu0  ;;  %v1190_v6 = vpop.f32.mrb[0].mxu1 }
 0x272   : > { %v742_v9 = vadd.f32 %v1182_v5, %v629_v1  ;;  %v750_v10 = vadd.f32 %v1190_v6, %v637_v2  ;;  %v677_v11 = vpop.f32.mrb[1].mxu0  ;;  %v709_v12 = vpop.f32.mrb[1].mxu1  ;;  %v806_v1 = vld [vmem:[%s1762_s9 + $0x70] sm:$0xff] (!%p1092_p5) }
 0x273   : > { %v740_v15 = vadd.f32 %v677_v11, %v627_v3  ;;  %v748_v16 = vadd.f32 %v709_v12, %v635_v4  ;;  %v1183_v17 = vpop.f32.mrb[2].mxu0  ;;  %v1191_v18 = vpop.f32.mrb[2].mxu1  ;;  %880 = vperm.xlu0 (!%p1092_p5), %1364, %v806_v1  }
 0x274   : > { %758 = vst [vmem:[%s1766_s8 + $0x10] sm:$0xff] %v742_v9  ;;  %766 = vst [vmem:[%s1766_s8 + $0x50] sm:$0xff] %v750_v10  ;;  %v743_v19 = vadd.f32 %v1183_v17, %v630_v7  ;;  %v751_v20 = vadd.f32 %v1191_v18, %v638_v8  ;;  %v680_v21 = vpop.f32.mrb[3].mxu0  ;;  %v712_v22 = vpop.f32.mrb[3].mxu1 }
 0x275   : > { %756 = vst [vmem:[%s1766_s8] sm:$0xff] %v740_v15  ;;  %764 = vst [vmem:[%s1766_s8 + $0x40] sm:$0xff] %v748_v16  ;;  %v741_v23 = vadd.f32 %v680_v21, %v628_v13  ;;  %v749_v24 = vadd.f32 %v712_v22, %v636_v14  ;;  %v821_v4 = vpop.permute.xlu1 (!%p1092_p5), %820  ;;  %v811_v5 = vpop.permute.xlu0 (!%p1092_p5), %810 }
 0x276   : > { %759 = vst [vmem:[%s1766_s8 + $0x18] sm:$0xff] %v743_v19  ;;  %767 = vst [vmem:[%s1766_s8 + $0x58] sm:$0xff] %v751_v20 }
 0x277   : > { %757 = vst [vmem:[%s1766_s8 + $0x8] sm:$0xff] %v741_v23  ;;  %765 = vst [vmem:[%s1766_s8 + $0x48] sm:$0xff] %v749_v24 }
 0x279   : > { %v1186_v29 = vpop.f32.mrb[4].mxu0  ;;  %v1194_v30 = vpop.f32.mrb[4].mxu1  ;;  %775 = sbr.rel (%p1092_p5) target bundleno = 758 (0x2f6), region = 90 }
 0x27a   : > { %v746_v33 = vadd.f32 %v1186_v29, %v633_v25  ;;  %v754_v34 = vadd.f32 %v1194_v30, %v641_v26  ;;  %v693_v35 = vpop.f32.mrb[5].mxu0  ;;  %v725_v36 = vpop.f32.mrb[5].mxu1 }
 0x27b   : > { %v744_v39 = vadd.f32 %v693_v35, %v631_v27  ;;  %v752_v40 = vadd.f32 %v725_v36, %v639_v28  ;;  %v1187_v41 = vpop.f32.mrb[6].mxu0  ;;  %v1195_v42 = vpop.f32.mrb[6].mxu1  ;;  %v778_v2 = vld [vmem:[%s1766_s8 + $0x10] sm:$0xff] (!%p1092_p5) }
 0x27c   : > { %762 = vst [vmem:[%s1766_s8 + $0x30] sm:$0xff] %v746_v33  ;;  %770 = vst [vmem:[%s1766_s8 + $0x70] sm:$0xff] %v754_v34  ;;  %v747_v43 = vadd.f32 %v1187_v41, %v634_v31  ;;  %v755_v44 = vadd.f32 %v1195_v42, %v642_v32  ;;  %v696_v45 = vpop.f32.mrb[7].mxu0  ;;  %v728_v46 = vpop.f32.mrb[7].mxu1  ;;  %v776_v3 = vld [vmem:[%s1766_s8] sm:$0xff] (!%p1092_p5)  ;;  %v890_v6 = vmul.f32 (!%p1092_p5), %v821_v4, %v778_v2  ;;  %v786_v33 = vld [vmem:[%s1766_s8 + $0x50] sm:$0xff] (!%p1092_p5) }
 0x27d   : > { %760 = vst [vmem:[%s1766_s8 + $0x20] sm:$0xff] %v744_v39  ;;  %768 = vst [vmem:[%s1766_s8 + $0x60] sm:$0xff] %v752_v40  ;;  %v745_v47 = vadd.f32 %v696_v45, %v632_v37  ;;  %v753_v48 = vadd.f32 %v728_v46, %v640_v38  ;;  %v888_v7 = vmul.f32 (!%p1092_p5), %v811_v5, %v776_v3  ;;  %v779_v8 = vld [vmem:[%s1766_s8 + $0x18] sm:$0xff] (!%p1092_p5)  ;;  %v826_v10 = vpop.permute.xlu1 (!%p1092_p5), %825  ;;  %v816_v11 = vpop.permute.xlu0 (!%p1092_p5), %815  ;;  %v784_v27 = vld [vmem:[%s1766_s8 + $0x40] sm:$0xff] (!%p1092_p5) }
 0x27e   : > { %763 = vst [vmem:[%s1766_s8 + $0x38] sm:$0xff] %v747_v43  ;;  %771 = vst [vmem:[%s1766_s8 + $0x78] sm:$0xff] %v755_v44  ;;  %v777_v9 = vld [vmem:[%s1766_s8 + $0x8] sm:$0xff] (!%p1092_p5)  ;;  %v891_v12 = vmul.f32 (!%p1092_p5), %v826_v10, %v779_v8  ;;  %v787_v32 = vld [vmem:[%s1766_s8 + $0x58] sm:$0xff] (!%p1092_p5) }
 0x27f   : > { %761 = vst [vmem:[%s1766_s8 + $0x28] sm:$0xff] %v745_v47  ;;  %769 = vst [vmem:[%s1766_s8 + $0x68] sm:$0xff] %v753_v48  ;;  %v889_v13 = vmul.f32 (!%p1092_p5), %v816_v11, %v777_v9  ;;  %v785_v26 = vld [vmem:[%s1766_s8 + $0x48] sm:$0xff] (!%p1092_p5) }
 0x280   : > { %906 = vst [vmem:[%s1766_s8 + $0x10] sm:$0xff] %v890_v6  ;;  %904 = vst [vmem:[%s1766_s8] sm:$0xff] %v888_v7 }
 0x281   : > { %907 = vst [vmem:[%s1766_s8 + $0x18] sm:$0xff] %v891_v12  ;;  %905 = vst [vmem:[%s1766_s8 + $0x8] sm:$0xff] %v889_v13  ;;  %v836_v16 = vpop.permute.xlu1 %835  ;;  %v831_v17 = vpop.permute.xlu0 %830 }
 0x283   : > { %v782_v21 = vld [vmem:[%s1766_s8 + $0x30] sm:$0xff] }
 0x284   : > { %v780_v15 = vld [vmem:[%s1766_s8 + $0x20] sm:$0xff]  ;;  %v790_v45 = vld [vmem:[%s1766_s8 + $0x70] sm:$0xff] }
 0x285   : > { %v892_v19 = vmul.f32 %v831_v17, %v780_v15  ;;  %v783_v20 = vld [vmem:[%s1766_s8 + $0x38] sm:$0xff]  ;;  %v846_v22 = vpop.permute.xlu1 %845  ;;  %v841_v23 = vpop.permute.xlu0 %840  ;;  %v788_v39 = vld [vmem:[%s1766_s8 + $0x60] sm:$0xff] }
 0x286   : > { %v781_v14 = vld [vmem:[%s1766_s8 + $0x28] sm:$0xff]  ;;  %v895_v24 = vmul.f32 %v846_v22, %v783_v20  ;;  %v894_v25 = vmul.f32 %v841_v23, %v782_v21  ;;  %v791_v44 = vld [vmem:[%s1766_s8 + $0x78] sm:$0xff] }
 0x287   : > { %v893_v18 = vmul.f32 %v836_v16, %v781_v14  ;;  %908 = vst [vmem:[%s1766_s8 + $0x20] sm:$0xff] %v892_v19  ;;  %v789_v38 = vld [vmem:[%s1766_s8 + $0x68] sm:$0xff] }
 0x288   : > { %911 = vst [vmem:[%s1766_s8 + $0x38] sm:$0xff] %v895_v24  ;;  %910 = vst [vmem:[%s1766_s8 + $0x30] sm:$0xff] %v894_v25 }
 0x289   : > { %909 = vst [vmem:[%s1766_s8 + $0x28] sm:$0xff] %v893_v18  ;;  %v856_v28 = vpop.permute.xlu1 %855  ;;  %v851_v29 = vpop.permute.xlu0 %850 }
 0x28a   : > { %v897_v30 = vmul.f32 %v856_v28, %v785_v26  ;;  %v896_v31 = vmul.f32 %v851_v29, %v784_v27 }
 0x28c   : > { %913 = vst [vmem:[%s1766_s8 + $0x48] sm:$0xff] %v897_v30  ;;  %912 = vst [vmem:[%s1766_s8 + $0x40] sm:$0xff] %v896_v31 }
 0x28d   : > { %v866_v34 = vpop.permute.xlu1 %865  ;;  %v861_v35 = vpop.permute.xlu0 %860 }
 0x28e   : > { %v899_v36 = vmul.f32 %v866_v34, %v787_v32  ;;  %v898_v37 = vmul.f32 %v861_v35, %v786_v33 }
 0x290   : > { %915 = vst [vmem:[%s1766_s8 + $0x58] sm:$0xff] %v899_v36  ;;  %914 = vst [vmem:[%s1766_s8 + $0x50] sm:$0xff] %v898_v37 }
 0x291   : > { %v876_v40 = vpop.permute.xlu1 %875  ;;  %v871_v41 = vpop.permute.xlu0 %870 }
 0x292   : > { %v901_v42 = vmul.f32 %v876_v40, %v789_v38  ;;  %v900_v43 = vmul.f32 %v871_v41, %v788_v39 }
 0x294   : > { %917 = vst [vmem:[%s1766_s8 + $0x68] sm:$0xff] %v901_v42  ;;  %916 = vst [vmem:[%s1766_s8 + $0x60] sm:$0xff] %v900_v43 }
 0x295   : > { %v886_v46 = vpop.permute.xlu1 %885 }
 0x296   : > { %v903_v48 = vmul.f32 %v886_v46, %v791_v44 }
 0x298   : > { %919 = vst [vmem:[%s1766_s8 + $0x78] sm:$0xff] %v903_v48 }
 0x2f2   : > { %v881_v47 = vpop.permute.xlu0 %880 }
 0x2f3   : > { %v902_v49 = vmul.f32 %v881_v47, %v790_v45 }
 0x2f5   : > { %918 = vst [vmem:[%s1766_s8 + $0x70] sm:$0xff] %v902_v49 }
 0x2f6 PF: > { %s1099_s23 = sshll.u32 %s1520_s24, 11  ;;  %s2033_s13 = sld [smem:[#allocation18_spill]] }
 0x2f7   : > { %s934_s5 = sshll.u32 %s1766_s8, 4  ;;  %s1928_s0 = scalar_lea.sflag [#allocation5], %s318_s30  ;;  %s1924_s5 = int_to_ptr.vmem [resolvable:$true] %s934_s5 }
 0x2f8   : > { %s1394_s7 = scalar_lea.vmem %s1924_s5, 2048  ;;  %p2034_p9 = scmp.ne.s32.totalorder %s2027_s11, 0 }
 0x2f9   : > { %p1395_p4 = scmp.ne.s32.totalorder %s1924_s5, %s1394_s7  ;;  %s1539_s24 = smov [#allocation7]  }
 0x2fa   : > { %s1398_s4 = sshll.u32 %s1539_s24, 4  ;;  %s1399_s4 = int_to_ptr.vmem [resolvable:$false] %s1398_s4 }
 0x2fb   : > { %p1396_p10 = pnand %p1395_p4, %p2034_p9  ;;  %s1400_s10 = scalar_lea.vmem %s1399_s4, 4096 }
 0x2fc   : > { %s1921_s28 = scalar_lea.hbm %s2033_s13, %s1099_s23  ;;  %p1401_p0 = scmp.lt.s32.totalorder %s1924_s5, %s1399_s4 }
 0x2fd   : > { %p1397_p11 = pneg %p1396_p10  ;;  %p1402_p1 = scmp.lt.s32.totalorder %s1400_s10, %s1394_s7 }
 0x2ff   : > { %p1403_p7 = por %p1402_p1, %p1401_p0 }
 0x301   : > { %p1404_p8 = pnand %p1403_p7, %p1397_p11 }
 0x303   : > { %1407 = shalt.err (!%p1404_p8)
}
 0x304   : > { %s1408_s30 = scalar_lea.hbm %s1921_s28, 2048  ;;  %s1412_s22 = scalar_lea.hbm %s2033_s13, 6144 }
 0x305   : > { %p1409_p13 = scmp.ne.s32.totalorder %s1921_s28, %s1408_s30  ;;  %p1413_p12 = scmp.lt.u32.totalorder %s1921_s28, %s2033_s13 }
 0x306   : > { %p1414_p2 = scmp.lt.u32.totalorder %s1412_s22, %s1408_s30  ;;  %p1416_p4 = scmp.lt.u32.totalorder %s1408_s30, %s1921_s28 }
 0x307   : > { %p1410_p3 = pnand %p1409_p13, %p2034_p9 }
 0x308   : > { %p1415_p5 = por %p1414_p2, %p1413_p12 }
 0x309   : > { %p1411_p6 = pneg %p1410_p3 }
 0x30a   : > { %p1417_p10 = por %p1416_p4, %p1415_p5 }
 0x30c   : > { %p1418_p11 = pnand %p1417_p10, %p1411_p6 }
 0x30e   : > { %1421 = shalt.err (!%p1418_p11)
}
 0x30f   : > { %s1540_s18 = smov 128   ;;  %s1541_s23 = smov 8  }
 0x310   : > { %1231 = dma.vmem_to_hbm [thread:$0]  (%p2034_p9), %s1924_s5, 2048, %s1921_s28, %s1928_s0, %s1540_s18, %s1540_s18, %s1541_s23  }
 0x311 PF: > { %p1237_p0 = scmp.ge.s32.totalorder %s1532_s27, 2  ;;  %s949_s12 = sand.u32 1, %s1484_s15  }
 0x312   : > { %p2035_p1 = scmp.ne.s32.totalorder %s2029_s14, 0  ;;  %s950_s9 = scalar_lea.sflag [#allocation5], %s949_s12 }
 0x314   : > { %p1234_p7 = pnand %p1237_p0, %p2035_p1 }
 0x316   : > { %1479 = dma.done.wait (!%p1234_p7), %s950_s9, 2048  }
 0x317   : > { %1481 = vsyncadd (!%p1234_p7), %s950_s9, 4294965248  ;;  %s20_s27 = sadd.s32 1, %s1532_s27   ;;  %s2037_s11 = sld [smem:[#allocation15_spill]] }
 0x318   : > { %p1957_p8 = scmp.ge.s32.totalorder %s20_s27, 11   ;;  %s2038_s28 = sld [smem:[#allocation13_spill]] }
 0x319   : > { %s2039_s5 = sld [smem:[#allocation10_spill]]  ;;  %s2040_s22 = sld [smem:[#allocation14_spill]] }
 0x31a   : > { %s2041_s14 = sld [smem:[#allocation11_spill]]  ;;  %s2042_s0 = sld [smem:[#allocation12_spill]] }
 0x31b   : > { %s2043_s15 = smov %s1488_s16  ;;  %s2044_s16 = smov %s1492_s17 }
 0x31c   : > { %s2046_s18 = smov %s1500_s19  ;;  %s2048_s20 = smov %s1508_s21 }
 0x31d   : > { %s2045_s17 = smov %s2037_s11  ;;  %s2050_s23 = smov %s1524_s25 }
 0x31e   : > { %s2047_s19 = smov %s2038_s28  ;;  %s2051_s24 = smov %s1528_s26 }
 0x31f   : > { %s2049_s21 = smov %s2039_s5  ;;  %19 = sbr.rel (!%p1957_p8) target bundleno = 14 (0xe), region = 144 }
 0x320   : > { %s2052_s25 = smov %s2041_s14  ;;  %s2053_s26 = smov %s2042_s0 }
 0x326   :  { %955 = vsyncpa [#allocation4], 1 }
 0x327   :  { %957 = vsyncpa [#allocation4 + $0x1], 1 }
 0x328   :  { %958 = vsyncpa [#allocation5], 1 }
 0x329   :  { %960 = vsyncpa [#allocation5 + $0x1], 1 }

</bundles_post_ra>
